<compile_context>
chip_gen: v7x
topology: tpu7x:2x2x1
jax: 0.10.0
libtpu: 0.0.40
codegen_flags: <defaults>
</compile_context>

<pallas_src>
import functools

import jax
import jax.numpy as jnp
from jax import lax
from jax.experimental import pallas as pl
from jax.experimental.pallas import tpu as pltpu


def _round_up(v, m):
    return ((v + m - 1) // m) * m


def _rq_kernel(x_ref, embed_ref, embedT_ref, nhe2_ref,
               quant_ref, ind_ref, losspart_ref, ohpart_ref,
               *, b_actual, tb, needs_mask, dist_dtype):
    i = pl.program_id(0)

    x = x_ref[...]              # (TB, Dp) f32
    e = embed_ref[...]          # (Dp, Kp) f32, VMEM-resident across tiles
    et = embedT_ref[...]        # (Kp, Dp) f32, VMEM-resident across tiles
    nhe2 = nhe2_ref[...]        # (1, Kp)  f32  (= -0.5*||E_k||^2; padded codes = -FLT_MAX)

    TB, _ = x.shape
    Kp = e.shape[1]

    # score_k = x.E_k - 0.5*||E_k||^2  -->  same argmax as argmax(-dist)
    xe = jnp.dot(x.astype(dist_dtype), e.astype(dist_dtype),
                 preferred_element_type=jnp.float32)                 # (TB, Kp) MXU
    score = xe + nhe2

    # First-occurrence argmax along the codebook axis (torch.max semantics).
    m = jnp.max(score, axis=1, keepdims=True)
    iota_k = lax.broadcasted_iota(jnp.int32, (TB, Kp), 1)
    cand = jnp.where(score == m, iota_k, Kp)
    ind = jnp.min(cand, axis=1, keepdims=True)                       # (TB, 1) i32
    ind_ref[...] = ind

    # One-hot gather of the selected codewords via MXU (pre-transposed codebook).
    onehot = (iota_k == ind).astype(jnp.float32)                     # (TB, Kp)
    quant = jnp.dot(onehot, et, preferred_element_type=jnp.float32)  # (TB, Dp)
    quant_ref[...] = quant

    # Mask batch-padding rows (only when the batch was actually padded).
    if needs_mask:
        row = lax.broadcasted_iota(jnp.int32, (TB, 1), 0) + i * tb
        valid = (row < b_actual).astype(jnp.float32)                 # (TB, 1)
    else:
        valid = jnp.float32(1.0)

    # Per-tile partial squared-error sum (padded D columns are zero in both).
    d = (quant - x) * valid
    losspart_ref[...] = jnp.sum(d * d).reshape(1, 1, 1)

    # Per-tile partial one-hot counts (padded rows contribute nothing).
    ohpart_ref[...] = jnp.sum(onehot * valid, axis=0, keepdims=True).reshape(1, 1, Kp)


def _vmem_estimate_bytes(tb, dp, kp):
    f = 4
    # inputs / outputs (x2 for double buffering) + (TB, Kp) intermediates
    io = 2 * f * (tb * dp          # x tile
                  + dp * kp        # embed
                  + kp * dp        # embed^T
                  + kp             # -0.5*||E||^2
                  + tb * dp        # quant tile
                  + tb             # indices
                  + 1 + kp)        # partials
    interm = 4 * f * tb * kp       # score / iota / onehot / cand
    return io + interm


def residual_quantization_forward(x, embed, cluster_size, decay=0.99, eps=1e-5,
                                  block_b=128, distance_dtype=jnp.float32):
    """Functional forward of ResidualQuantizationLayer (num_levels effectively 1).

    Returns (output, quantized_x, num_small_clusters, sum_quant_loss, new_cluster_size).
    `output` is int32 (torch returns int64; values are identical).
    """
    B, D = x.shape
    K = embed.shape[1]

    Dp = _round_up(D, 128)
    Kp = _round_up(K, 128)

    # Batch tile: multiple of 8, capped at block_b, shrunk to fit a portable
    # VMEM budget (v7x has half the VMEM of v5e/v6e).
    tb = min(block_b, _round_up(B, 8))
    while tb > 8 and _vmem_estimate_bytes(tb, Dp, Kp) > 40 * (1 << 20):
        tb = max(8, tb // 2)
    Bp = _round_up(B, tb)
    n_tiles = Bp // tb

    xf = x.astype(jnp.float32)
    ef = embed.astype(jnp.float32)

    xp = jnp.pad(xf, ((0, Bp - B), (0, Dp - D)))                     # (Bp, Dp)
    ep = jnp.pad(ef, ((0, Dp - D), (0, Kp - K)))                     # (Dp, Kp)
    etp = ep.T                                                       # (Kp, Dp)
    e2 = jnp.sum(ef * ef, axis=0)                                    # (K,)
    neg_half_e2 = jnp.pad(-0.5 * e2, (0, Kp - K),
                          constant_values=jnp.finfo(jnp.float32).min).reshape(1, Kp)

    kernel = functools.partial(_rq_kernel, b_actual=B, tb=tb,
                               needs_mask=(Bp != B), dist_dtype=distance_dtype)

    est = _vmem_estimate_bytes(tb, Dp, Kp)
    vmem_limit = int(min(48 * (1 << 20), max(16 * (1 << 20), 2 * est)))

    flops = 4 * Bp * Dp * Kp                                         # two MXU matmuls
    bytes_accessed = 4 * (Bp * Dp * 2 + Dp * Kp * 2 + Kp + Bp + n_tiles * (1 + Kp))

    quant, ind, loss_part, oh_part = pl.pallas_call(
        kernel,
        grid=(n_tiles,),
        in_specs=[
            pl.BlockSpec((tb, Dp), lambda i: (i, 0)),                # x tile
            pl.BlockSpec((Dp, Kp), lambda i: (0, 0)),                # codebook (resident)
            pl.BlockSpec((Kp, Dp), lambda i: (0, 0)),                # codebook^T (resident)
            pl.BlockSpec((1, Kp), lambda i: (0, 0)),                 # -0.5*||E||^2
        ],
        out_specs=(
            pl.BlockSpec((tb, Dp), lambda i: (i, 0)),                # quantized_x
            pl.BlockSpec((tb, 1), lambda i: (i, 0)),                 # indices
            pl.BlockSpec((1, 1, 1), lambda i: (i, 0, 0)),            # per-tile sq-err sum
            pl.BlockSpec((1, 1, Kp), lambda i: (i, 0, 0)),           # per-tile onehot sum
        ),
        out_shape=(
            jax.ShapeDtypeStruct((Bp, Dp), jnp.float32),
            jax.ShapeDtypeStruct((Bp, 1), jnp.int32),
            jax.ShapeDtypeStruct((n_tiles, 1, 1), jnp.float32),
            jax.ShapeDtypeStruct((n_tiles, 1, Kp), jnp.float32),
        ),
        compiler_params=pltpu.CompilerParams(
            dimension_semantics=("parallel",),
            vmem_limit_bytes=vmem_limit,
        ),
        cost_estimate=pl.CostEstimate(
            flops=flops, transcendentals=0, bytes_accessed=bytes_accessed),
    )(xp, ep, etp, neg_half_e2)

    # Tiny wrapper-side reductions (keeps the batch grid axis fully parallel).
    output = ind[:B, :]                                              # (B, 1) int32
    quantized_x = quant[:B, :D]                                      # straight-through fwd value
    sum_quant_loss = jnp.sum(loss_part) / (B * D)                    # MSE over ORIGINAL B*D
    onehot_sum = jnp.sum(oh_part, axis=0).reshape(Kp)[:K]
    new_cs = cluster_size.astype(jnp.float32) * decay + onehot_sum * (1.0 - decay)
    num_small_clusters = jnp.sum((new_cs < 1.0).astype(jnp.int32))
    del eps  # eps only appears in the stateful training codebook renormalization
    return output, quantized_x, num_small_clusters, sum_quant_loss, new_cs


if __name__ == "__main__":
    # Small shapes consistent with the module: x is (batch, latent_size).
    B, D, K = 8, 32, 128
    key = jax.random.PRNGKey(0)
    kx, ke = jax.random.split(key)
    x = jax.random.normal(kx, (B, D), dtype=jnp.float32)
    # Deterministic synthetic codebook (module init is zeros, which is degenerate;
    # emulate a post-generate_codebook state).
    embed = 0.5 * jax.random.normal(ke, (D, K), dtype=jnp.float32)   # (latent, n_embed)
    cluster_size = jnp.zeros((K,), dtype=jnp.float32)
    decay = 0.99

    out = residual_quantization_forward(x, embed, cluster_size, decay=decay)
    out = jax.block_until_ready(out)
    output, quantized_x, num_small_clusters, sum_quant_loss, new_cs = out

    # Pure-JAX reference check (mirrors the torch forward).
    dist = (x ** 2).sum(1, keepdims=True) - 2.0 * x @ embed + (embed ** 2).sum(0, keepdims=True)
    ref_ind = jnp.argmax(-dist, axis=1)
    ref_quant = embed.T[ref_ind]
    ref_loss = jnp.mean((ref_quant - x) ** 2)
    ref_onehot = jax.nn.one_hot(ref_ind, K, dtype=jnp.float32)
    ref_cs = cluster_size * decay + ref_onehot.sum(0) * (1.0 - decay)
    ref_nsmall = jnp.sum((ref_cs < 1.0).astype(jnp.int32))

    assert jnp.array_equal(output[:, 0], ref_ind.astype(jnp.int32))
    assert jnp.allclose(quantized_x, ref_quant, atol=1e-5, rtol=1e-5)
    assert jnp.allclose(sum_quant_loss, ref_loss, atol=1e-5, rtol=1e-5)
    assert jnp.allclose(new_cs, ref_cs, atol=1e-6, rtol=1e-6)
    assert int(num_small_clusters) == int(ref_nsmall)

    print("KERNEL_OK")
</pallas_src>

<mosaic_0001>
module attributes {stable_mosaic.version = 11 : i64} {
  func.func @_rq_kernel(%arg0: i32, %arg1: memref<8x128xf32, #tpu.memory_space<vmem>>, %arg2: memref<128x128xf32, #tpu.memory_space<vmem>>, %arg3: memref<128x128xf32, #tpu.memory_space<vmem>>, %arg4: memref<1x128xf32, #tpu.memory_space<vmem>>, %arg5: memref<8x128xf32, #tpu.memory_space<vmem>>, %arg6: memref<8x1xi32, #tpu.memory_space<vmem>>, %arg7: memref<1x1x1xf32, #tpu.memory_space<vmem>>, %arg8: memref<1x1x128xf32, #tpu.memory_space<vmem>>) attributes {dimension_semantics = [#tpu.dimension_semantics<parallel>], iteration_bounds = array<i64: 1>, scalar_prefetch = 0 : i64, scratch_operands = 0 : i64, tpu.core_type = #tpu.core_type<tc>, window_params = [{transform_indices = @transform_0, window_bounds = array<i64: 8, 128>}, {pipeline_mode = #tpu.pipeline_mode<synchronous>, transform_indices = @transform_1, window_bounds = array<i64: 128, 128>}, {pipeline_mode = #tpu.pipeline_mode<synchronous>, transform_indices = @transform_2, window_bounds = array<i64: 128, 128>}, {pipeline_mode = #tpu.pipeline_mode<synchronous>, transform_indices = @transform_3, window_bounds = array<i64: 1, 128>}, {transform_indices = @transform_4, window_bounds = array<i64: 8, 128>}, {transform_indices = @transform_5, window_bounds = array<i64: 8, 1>}, {transform_indices = @transform_6, window_bounds = array<i64: 1, 1, 1>}, {transform_indices = @transform_7, window_bounds = array<i64: 1, 1, 128>}]} {
    %c0 = arith.constant 0 : index
    %c0_0 = arith.constant 0 : index
    %0 = vector.load %arg1[%c0, %c0_0] : memref<8x128xf32, #tpu.memory_space<vmem>>, vector<8x128xf32>
    %c0_1 = arith.constant 0 : index
    %c0_2 = arith.constant 0 : index
    %1 = vector.load %arg2[%c0_1, %c0_2] : memref<128x128xf32, #tpu.memory_space<vmem>>, vector<128x128xf32>
    %c0_3 = arith.constant 0 : index
    %c0_4 = arith.constant 0 : index
    %2 = vector.load %arg3[%c0_3, %c0_4] : memref<128x128xf32, #tpu.memory_space<vmem>>, vector<128x128xf32>
    %c0_5 = arith.constant 0 : index
    %c0_6 = arith.constant 0 : index
    %3 = vector.load %arg4[%c0_5, %c0_6] : memref<1x128xf32, #tpu.memory_space<vmem>>, vector<1x128xf32>
    %cst = arith.constant dense<0.000000e+00> : vector<8x128xf32>
    %4 = tpu.matmul %0, %1, %cst {dimension_numbers = #tpu.dot_dimension_numbers<[1], [0], [0], [1], [0, 0, 1, 1], [], []>} : vector<8x128xf32>, vector<128x128xf32>, vector<8x128xf32> -> vector<8x128xf32>
    %5 = vector.broadcast %3 : vector<1x128xf32> to vector<8x128xf32>
    %6 = arith.addf %4, %5 : vector<8x128xf32>
    %cst_7 = arith.constant dense<0xFF800000> : vector<8xf32>
    %7 = vector.multi_reduction <maximumf>, %6, %cst_7 [1] : vector<8x128xf32> to vector<8xf32>
    %8 = vector.shape_cast %7 : vector<8xf32> to vector<8x1xf32>
    %9 = tpu.iota {dimensions = array<i32: 1>} : vector<8x128xi32>
    %10 = vector.broadcast %8 : vector<8x1xf32> to vector<8x128xf32>
    %11 = arith.cmpf oeq, %6, %10 : vector<8x128xf32>
    %c128_i32 = arith.constant 128 : i32
    %12 = vector.broadcast %c128_i32 : i32 to vector<8x128xi32>
    %13 = arith.select %11, %9, %12 : vector<8x128xi1>, vector<8x128xi32>
    %cst_8 = arith.constant dense<2147483647> : vector<8xi32>
    %14 = vector.multi_reduction <minsi>, %13, %cst_8 [1] : vector<8x128xi32> to vector<8xi32>
    %15 = vector.shape_cast %14 : vector<8xi32> to vector<8x1xi32>
    %c0_9 = arith.constant 0 : index
    %c0_10 = arith.constant 0 : index
    %16 = vector.load %arg6[%c0_9, %c0_10] : memref<8x1xi32, #tpu.memory_space<vmem>>, vector<8x1xi32>
    tpu.vector_store %arg6[%c0_9, %c0_10], %15 {strides = array<i32>} : memref<8x1xi32, #tpu.memory_space<vmem>>, vector<8x1xi32>,
    %17 = vector.broadcast %15 : vector<8x1xi32> to vector<8x128xi32>
    %18 = arith.cmpi eq, %9, %17 : vector<8x128xi32>
    %19 = arith.extui %18 : vector<8x128xi1> to vector<8x128xi32>
    %20 = arith.sitofp %19 : vector<8x128xi32> to vector<8x128xf32>
    %cst_11 = arith.constant dense<0.000000e+00> : vector<8x128xf32>
    %21 = tpu.matmul %20, %2, %cst_11 {dimension_numbers = #tpu.dot_dimension_numbers<[1], [0], [0], [1], [0, 0, 1, 1], [], []>} : vector<8x128xf32>, vector<128x128xf32>, vector<8x128xf32> -> vector<8x128xf32>
    %c0_12 = arith.constant 0 : index
    %c0_13 = arith.constant 0 : index
    %22 = vector.load %arg5[%c0_12, %c0_13] : memref<8x128xf32, #tpu.memory_space<vmem>>, vector<8x128xf32>
    tpu.vector_store %arg5[%c0_12, %c0_13], %21 {strides = array<i32>} : memref<8x128xf32, #tpu.memory_space<vmem>>, vector<8x128xf32>,
    %23 = arith.subf %21, %0 : vector<8x128xf32>
    %cst_14 = arith.constant 1.000000e+00 : f32
    %24 = vector.broadcast %cst_14 : f32 to vector<8x128xf32>
    %25 = arith.mulf %23, %24 : vector<8x128xf32>
    %26 = arith.mulf %25, %25 : vector<8x128xf32>
    %27 = vector.shape_cast %26 : vector<8x128xf32> to vector<1x8x128xf32>
    %cst_15 = arith.constant dense<0.000000e+00> : vector<1xf32>
    %28 = vector.multi_reduction <add>, %27, %cst_15 [1, 2] : vector<1x8x128xf32> to vector<1xf32>
    %29 = vector.shape_cast %28 : vector<1xf32> to vector<1x1x1xf32>
    %30 = vector.extract %29[0, 0, 0] : f32 from vector<1x1x1xf32>
    %31 = vector.broadcast %30 : f32 to vector<1x1x1xf32>
    %c0_16 = arith.constant 0 : index
    %c0_17 = arith.constant 0 : index
    %c0_18 = arith.constant 0 : index
    %32 = vector.load %arg7[%c0_16, %c0_17, %c0_18] : memref<1x1x1xf32, #tpu.memory_space<vmem>>, vector<1x1x1xf32>
    tpu.vector_store %arg7[%c0_16, %c0_17, %c0_18], %31 {strides = array<i32>} : memref<1x1x1xf32, #tpu.memory_space<vmem>>, vector<1x1x1xf32>,
    %cst_19 = arith.constant 1.000000e+00 : f32
    %33 = vector.broadcast %cst_19 : f32 to vector<8x128xf32>
    %34 = arith.mulf %20, %33 : vector<8x128xf32>
    %cst_20 = arith.constant dense<0.000000e+00> : vector<128xf32>
    %35 = vector.multi_reduction <add>, %34, %cst_20 [0] : vector<8x128xf32> to vector<128xf32>
    %36 = vector.shape_cast %35 : vector<128xf32> to vector<1x128xf32>
    %37 = vector.shape_cast %36 : vector<1x128xf32> to vector<1x1x128xf32>
    %c0_21 = arith.constant 0 : index
    %c0_22 = arith.constant 0 : index
    %c0_23 = arith.constant 0 : index
    %38 = vector.load %arg8[%c0_21, %c0_22, %c0_23] : memref<1x1x128xf32, #tpu.memory_space<vmem>>, vector<1x1x128xf32>
    tpu.vector_store %arg8[%c0_21, %c0_22, %c0_23], %37 {strides = array<i32>} : memref<1x1x128xf32, #tpu.memory_space<vmem>>, vector<1x1x128xf32>,
    return
  }
  func.func @transform_0(%arg0: i32) -> (i32, i32) {
    %c0_i32 = arith.constant 0 : i32
    %c0_i32_0 = arith.constant 0 : i32
    return %arg0, %c0_i32 : i32, i32
  }
  func.func @transform_1(%arg0: i32) -> (i32, i32) {
    %c0_i32 = arith.constant 0 : i32
    %c0_i32_0 = arith.constant 0 : i32
    %c0_i32_1 = arith.constant 0 : i32
    return %c0_i32, %c0_i32_0 : i32, i32
  }
  func.func @transform_2(%arg0: i32) -> (i32, i32) {
    %c0_i32 = arith.constant 0 : i32
    %c0_i32_0 = arith.constant 0 : i32
    %c0_i32_1 = arith.constant 0 : i32
    return %c0_i32, %c0_i32_0 : i32, i32
  }
  func.func @transform_3(%arg0: i32) -> (i32, i32) {
    %c0_i32 = arith.constant 0 : i32
    %c0_i32_0 = arith.constant 0 : i32
    %c0_i32_1 = arith.constant 0 : i32
    return %c0_i32, %c0_i32_0 : i32, i32
  }
  func.func @transform_4(%arg0: i32) -> (i32, i32) {
    %c0_i32 = arith.constant 0 : i32
    %c0_i32_0 = arith.constant 0 : i32
    return %arg0, %c0_i32 : i32, i32
  }
  func.func @transform_5(%arg0: i32) -> (i32, i32) {
    %c0_i32 = arith.constant 0 : i32
    %c0_i32_0 = arith.constant 0 : i32
    return %arg0, %c0_i32 : i32, i32
  }
  func.func @transform_6(%arg0: i32) -> (i32, i32, i32) {
    %c0_i32 = arith.constant 0 : i32
    %c0_i32_0 = arith.constant 0 : i32
    %c0_i32_1 = arith.constant 0 : i32
    return %arg0, %c0_i32, %c0_i32_0 : i32, i32, i32
  }
  func.func @transform_7(%arg0: i32) -> (i32, i32, i32) {
    %c0_i32 = arith.constant 0 : i32
    %c0_i32_0 = arith.constant 0 : i32
    %c0_i32_1 = arith.constant 0 : i32
    return %arg0, %c0_i32, %c0_i32_0 : i32, i32, i32
  }
}

</mosaic_0001>

<bundles_post_ra>
// kernel: tpu_custom_call.1
= control target key start
LH: loop header
LB: loop body
LE: loop exit
PB: predicated region body
PF: predicated region fallthrough
CT: control target
= control target key end

     0   :  { %13 = vsyncpa [#allocation3], 0  ;;  %s816_s0 = inlined_call_operand.hbm [shape: f32[8,128], index: 0, kind: input, shape index: {}]   ;;  %s817_s1 = inlined_call_operand.hbm [shape: f32[128,128], index: 1, kind: input, shape index: {}]   ;;  %s818_s2 = inlined_call_operand.hbm [shape: f32[128,128], index: 2, kind: input, shape index: {}]   ;;  %s819_s3 = inlined_call_operand.vmem [shape: f32[1,128], index: 3, kind: input, shape index: {}]   ;;  %s820_s4 = inlined_call_operand.hbm [shape: f32[8,128], index: 4, kind: output, shape index: {0}]   ;;  %s821_s5 = inlined_call_operand.vmem [shape: s32[8,1], index: 5, kind: output, shape index: {1}]   ;;  %s822_s6 = inlined_call_operand.hbm [shape: f32[1,1,1], index: 6, kind: output, shape index: {2}]   ;;  %s823_s7 = inlined_call_operand.hbm [shape: f32[1,1,128], index: 7, kind: output, shape index: {3}]  }
   0x1   :  { %14 = vsyncpa [#allocation6], 0 }
   0x2   :  { %15 = vsyncpa [#allocation4], 0 }
   0x3   :  { %16 = vsyncpa [#allocation10], 0  ;;  %s645_s24 = smov [#allocation5]   ;;  %s505_s28 = scalar_lea.hbm %s817_s1, 2048 }
   0x4   :  { %s32_s25 = sshll.u32 %s645_s24, 4  ;;  %p506_p0 = scmp.ne.s32.totalorder %s817_s1, %s505_s28  ;;  %s33_s25 = int_to_ptr.vmem [resolvable:$true] %s32_s25 }
   0x5   :  { %p509_p1 = scmp.lt.u32.totalorder %s505_s28, %s817_s1 }
   0x7   :  { %p511_p2 = pnand %p509_p1, %p506_p0 }
   0x9   :  { %514 = shalt.err (!%p511_p2)
}
   0xa   :  { %s515_s10 = scalar_lea.vmem %s33_s25, 2048  ;;  %p520_p4 = scmp.lt.s32.totalorder %s33_s25, %s33_s25 }
   0xb   :  { %p516_p3 = scmp.ne.s32.totalorder %s33_s25, %s515_s10  ;;  %p521_p5 = scmp.lt.s32.totalorder %s515_s10, %s515_s10 }
   0xd   :  { %p522_p6 = por %p521_p5, %p520_p4 }
   0xf   :  { %p523_p7 = pnand %p522_p6, %p516_p3 }
  0x11   :  { %526 = shalt.err (!%p523_p7)
}
  0x12   :  { %s646_s11 = smov 128   ;;  %s647_s12 = smov 8  }
  0x13   :  { %38 = dma.hbm_to_vmem [thread:$0]  %s817_s1, 2048, %s33_s25, [#allocation6], %s646_s11, %s646_s11, %s647_s12  }
  0x14   :  { %s648_s15 = smov [#allocation2]   ;;  %s649_s17 = smov [#allocation7]  }
  0x15   :  { %s23_s16 = sshll.u32 %s648_s15, 4  ;;  %s44_s18 = sshll.u32 %s649_s17, 4  ;;  %s24_s16 = int_to_ptr.vmem [resolvable:$true] %s23_s16  ;;  %s45_s18 = int_to_ptr.vmem [resolvable:$true] %s44_s18 }
  0x16   :  { %s527_s21 = scalar_lea.hbm %s816_s0, 128 }
  0x17   :  { %p528_p8 = scmp.ne.s32.totalorder %s816_s0, %s527_s21  ;;  %p531_p9 = scmp.lt.u32.totalorder %s527_s21, %s816_s0 }
  0x19   :  { %p533_p10 = pnand %p531_p9, %p528_p8 }
  0x1b   :  { %536 = shalt.err (!%p533_p10)
}
  0x1c   :  { %s537_s1 = scalar_lea.vmem %s24_s16, 128  ;;  %p542_p12 = scmp.lt.s32.totalorder %s24_s16, %s24_s16 }
  0x1d   :  { %p538_p11 = scmp.ne.s32.totalorder %s24_s16, %s537_s1  ;;  %p543_p13 = scmp.lt.s32.totalorder %s537_s1, %s537_s1 }
  0x1f   :  { %p544_p0 = por %p543_p13, %p542_p12 }
  0x21   :  { %p545_p1 = pnand %p544_p0, %p538_p11 }
  0x23   :  { %548 = shalt.err (!%p545_p1)
}
  0x24   :  { %26 = dma.hbm_to_vmem [thread:$0]  %s816_s0, 128, %s24_s16, [#allocation3]  }
  0x25   :  { %s549_s30 = scalar_lea.hbm %s818_s2, 2048 }
  0x26   :  { %p550_p2 = scmp.ne.s32.totalorder %s818_s2, %s549_s30  ;;  %p553_p3 = scmp.lt.u32.totalorder %s549_s30, %s818_s2 }
  0x28   :  { %p555_p4 = pnand %p553_p3, %p550_p2 }
  0x2a   :  { %558 = shalt.err (!%p555_p4)
}
  0x2b   :  { %s559_s14 = scalar_lea.vmem %s45_s18, 2048  ;;  %p564_p6 = scmp.lt.s32.totalorder %s45_s18, %s45_s18 }
  0x2c   :  { %p560_p5 = scmp.ne.s32.totalorder %s45_s18, %s559_s14  ;;  %p565_p7 = scmp.lt.s32.totalorder %s559_s14, %s559_s14 }
  0x2e   :  { %p566_p8 = por %p565_p7, %p564_p6 }
  0x30   :  { %p567_p9 = pnand %p566_p8, %p560_p5 }
  0x32   :  { %570 = shalt.err (!%p567_p9)
}
  0x33   :  { %50 = dma.hbm_to_vmem [thread:$0]  %s818_s2, 2048, %s45_s18, [#allocation6], %s646_s11, %s646_s11, %s647_s12  }
  0x34   :  { %637 = dma.done.wait [#allocation3], 128  }
  0x35   :  { %638 = vsyncadd [#allocation3], 4294967168 }
  0x36   :  { %639 = dma.done.wait [#allocation6], 4096  }
  0x37   :  { %640 = vsyncadd [#allocation6], 4294963200  ;;  %v650_v0 = vmov 0.0|0.0   ;;  %vm651_vm0 = vmmov 0   ;;  %v652_v1 = vmov 0.0   ;;  %v63_v2 = vld [vmem:[#allocation5] sm:$0xff]  ;;  %v174_v31 = vlaneseq }
  0x38   :  { %443 = vmatprep.subr.bf16.mxu0 %v650_v0  ;;  %405 = vmatprep.mubr.msk.f32.mxu0 %vm651_vm0, %v652_v1  ;;  %v64_v3 = vld [vmem:[#allocation5 + $0x8] sm:$0xff]  ;;  %v65_v4 = vld [vmem:[#allocation5 + $0x10] sm:$0xff]  ;;  %v66_v6 = vld [vmem:[#allocation5 + $0x18] sm:$0xff]  ;;  %vm192_vm3 = vcmask 7168  }
  0x39   :  { %467 = vmatprep.subr.bf16.mxu1 %v650_v0  ;;  %440 = vmatprep.mubr.msk.f32.mxu1 %vm651_vm0, %v652_v1  ;;  %v444_v5 = vpack.c.bf16 %v64_v3, %v63_v2  ;;  %v447_v7 = vpack.c.bf16 %v66_v6, %v65_v4  ;;  %v67_v8 = vld [vmem:[#allocation5 + $0x20] sm:$0xff]  ;;  %v68_v9 = vld [vmem:[#allocation5 + $0x28] sm:$0xff]  ;;  %v69_v11 = vld [vmem:[#allocation5 + $0x30] sm:$0xff]  ;;  %v756_v32 = vand.u32 127, %v174_v31 }
  0x3a   :  { %v450_v10 = vpack.c.bf16 %v68_v9, %v67_v8  ;;  %v70_v12 = vld [vmem:[#allocation5 + $0x38] sm:$0xff]  ;;  %v71_v14 = vld [vmem:[#allocation5 + $0x40] sm:$0xff]  ;;  %v72_v15 = vld [vmem:[#allocation5 + $0x48] sm:$0xff]  ;;  %v653_v8 = vmov 1.0  }
  0x3b   :  { %445 = vmatpush3.bf16.msra.mxu0 %v444_v5  ;;  %v453_v13 = vpack.c.bf16 %v70_v12, %v69_v11  ;;  %v456_v16 = vpack.c.bf16 %v72_v15, %v71_v14  ;;  %v73_v17 = vld [vmem:[#allocation5 + $0x50] sm:$0xff]  ;;  %v74_v18 = vld [vmem:[#allocation5 + $0x58] sm:$0xff]  ;;  %v75_v20 = vld [vmem:[#allocation5 + $0x60] sm:$0xff] }
  0x3c   :  { %446 = vmatprep.subr.bf16.mxu0 %v650_v0  ;;  %v459_v19 = vpack.c.bf16 %v74_v18, %v73_v17  ;;  %v76_v21 = vld [vmem:[#allocation5 + $0x68] sm:$0xff]  ;;  %v77_v23 = vld [vmem:[#allocation5 + $0x70] sm:$0xff]  ;;  %v78_v24 = vld [vmem:[#allocation5 + $0x78] sm:$0xff] }
  0x3d   :  { %v462_v22 = vpack.c.bf16 %v76_v21, %v75_v20  ;;  %v465_v25 = vpack.c.bf16 %v78_v24, %v77_v23  ;;  %v750_v26 = vld [vmem:[#allocation2] sm:$0xff]  ;;  %v79_v37 = vld [vmem:[#allocation7] sm:$0xff]  ;;  %v80_v38 = vld [vmem:[#allocation7 + $0x8] sm:$0xff] }
  0x3e   :  { %v336_v27 = vld [vmem:[%s819_s3] ss:$0 sm:$0xff]  ;;  %v81_v39 = vld [vmem:[#allocation7 + $0x10] sm:$0xff]  ;;  %v468_v40 = vpack.c.bf16 %v80_v38, %v79_v37  ;;  %v83_v43 = vld [vmem:[#allocation7 + $0x20] sm:$0xff] }
  0x3f   :  { %448 = vmatpush3.bf16.msra.mxu0 %v447_v7  ;;  %v82_v41 = vld [vmem:[#allocation7 + $0x18] sm:$0xff]  ;;  %v84_v44 = vld [vmem:[#allocation7 + $0x28] sm:$0xff]  ;;  %v85_v46 = vld [vmem:[#allocation7 + $0x30] sm:$0xff] }
  0x40   :  { %449 = vmatprep.subr.bf16.mxu0 %v650_v0  ;;  %469 = vmatpush3.bf16.msra.mxu1 %v468_v40  ;;  %v471_v42 = vpack.c.bf16 %v82_v41, %v81_v39  ;;  %v474_v45 = vpack.c.bf16 %v84_v44, %v83_v43  ;;  %v86_v47 = vld [vmem:[#allocation7 + $0x38] sm:$0xff]  ;;  %v87_v49 = vld [vmem:[#allocation7 + $0x40] sm:$0xff]  ;;  %v88_v50 = vld [vmem:[#allocation7 + $0x48] sm:$0xff] }
  0x41   :  { %470 = vmatprep.subr.bf16.mxu1 %v650_v0  ;;  %v477_v48 = vpack.c.bf16 %v86_v47, %v85_v46  ;;  %v480_v51 = vpack.c.bf16 %v88_v50, %v87_v49  ;;  %v89_v52 = vld [vmem:[#allocation7 + $0x50] sm:$0xff]  ;;  %v90_v53 = vld [vmem:[#allocation7 + $0x58] sm:$0xff]  ;;  %v91_v55 = vld [vmem:[#allocation7 + $0x60] sm:$0xff] }
  0x42   :  { %v483_v54 = vpack.c.bf16 %v90_v53, %v89_v52  ;;  %v92_v56 = vld [vmem:[#allocation7 + $0x68] sm:$0xff]  ;;  %v93_v62 = vld [vmem:[#allocation7 + $0x70] sm:$0xff]  ;;  %v94_v63 = vld [vmem:[#allocation7 + $0x78] sm:$0xff] }
  0x43   :  { %451 = vmatpush3.bf16.msra.mxu0 %v450_v10  ;;  %v486_v57 = vpack.c.bf16 %v92_v56, %v91_v55  ;;  %v489_v2 = vpack.c.bf16 %v94_v63, %v93_v62 }
  0x44   :  { %452 = vmatprep.subr.bf16.mxu0 %v650_v0  ;;  %472 = vmatpush3.bf16.msra.mxu1 %v471_v42 }
  0x45   :  { %473 = vmatprep.subr.bf16.mxu1 %v650_v0 }
  0x47   :  { %454 = vmatpush3.bf16.msra.mxu0 %v453_v13 }
  0x48   :  { %455 = vmatprep.subr.bf16.mxu0 %v650_v0  ;;  %475 = vmatpush3.bf16.msra.mxu1 %v474_v45 }
  0x49   :  { %476 = vmatprep.subr.bf16.mxu1 %v650_v0 }
  0x4b   :  { %457 = vmatpush3.bf16.msra.mxu0 %v456_v16 }
  0x4c   :  { %458 = vmatprep.subr.bf16.mxu0 %v650_v0  ;;  %478 = vmatpush3.bf16.msra.mxu1 %v477_v48 }
  0x4d   :  { %479 = vmatprep.subr.bf16.mxu1 %v650_v0 }
  0x4f   :  { %460 = vmatpush3.bf16.msra.mxu0 %v459_v19 }
  0x50   :  { %461 = vmatprep.subr.bf16.mxu0 %v650_v0  ;;  %481 = vmatpush3.bf16.msra.mxu1 %v480_v51 }
  0x51   :  { %482 = vmatprep.subr.bf16.mxu1 %v650_v0 }
  0x53   :  { %463 = vmatpush3.bf16.msra.mxu0 %v462_v22 }
  0x54   :  { %464 = vmatprep.subr.bf16.mxu0 %v650_v0  ;;  %484 = vmatpush3.bf16.msra.mxu1 %v483_v54 }
  0x55   :  { %485 = vmatprep.subr.bf16.mxu1 %v650_v0 }
  0x57   :  { %466 = vmatpush3.bf16.msra.mxu0 %v465_v25 }
  0x58   :  { %487 = vmatpush3.bf16.msra.mxu1 %v486_v57 }
  0x59   :  { %488 = vmatprep.subr.bf16.mxu1 %v650_v0 }
  0x5a   :  { %406 = vmatmul.mubr.f32.vlgmr.msra.gmra.mrb[0].mxu0 %v750_v26 }
  0x5c   :  { %490 = vmatpush3.bf16.msra.mxu1 %v489_v2 }
 0x12d   :  { %v168_v28 = vpop.f32.mrb[0].mxu0 }
 0x12e   :  { %v169_v29 = vadd.f32 %v336_v27, %v168_v28  ;;  %v407_v30 = vpop.f32.mrb[1].mxu0 }
 0x130   :  { %172 = vmax.xlane.f32.xlu0 %v169_v29 }
 0x1bd   :  { %v173_v33 = vpop.xlane.xlu0 %172 }
 0x1be   :  { %vm176_vm1 = vcmp.eq.f32.partialorder %v169_v29, %v173_v33 }
 0x1bf   :  { %v177_v34 = vsel %vm176_vm1, %v756_v32, 128 }
 0x1c0   :  { %v179_v35 = vshra.s32 %v177_v34, 16  ;;  %v178_v58 = vand.u32 65535, %v177_v34 }
 0x1c2   :  { %v181_v36 = vcvt.s32.f32 %v179_v35  ;;  %v180_v60 = vcvt.s32.f32 %v178_v58 }
 0x1c4   :  { %182 = vmin.xlane.f32.xlu0 %v181_v36 }
 0x251   :  { %v183_v59 = vpop.xlane.xlu0 %182 }
 0x252   :  { %vm184_vm2 = vcmp.eq.f32.partialorder %v181_v36, %v183_v59  ;;  %v189_v3 = vcvt.f32.s32 %v183_v59 }
 0x253   :  { %v185_v61 = vsel %vm184_vm2, %v180_v60, inf }
 0x254   :  { %186 = vmin.xlane.f32.xlu1 %v185_v61  ;;  %v190_v5 = vshll.u32 %v189_v3, 16 }
 0x2e1   :  { %v187_v4 = vpop.xlane.xlu1 %186 }
 0x2e2   :  { %v188_v6 = vcvt.f32.s32 %v187_v4 }
 0x2e4   :  { %v191_v7 = vadd.s32 %v190_v5, %v188_v6 }
 0x2e6   :  { %193 = vst.msk [vmem:[%s821_s5] sm:$0xff] %vm192_vm3, %v191_v7  ;;  %vm194_vm4 = vcmp.eq.s32.totalorder %v756_v32, %v191_v7  ;;  %s654_s5 = smov [#allocation8]  }
 0x2e7   :  { %v337_v0 = vsel %vm194_vm4, 1.0, %v652_v1  ;;  %441 = vmatmul.mubr.msk.f32.vlgmr.msra.gmra.mrb[0].mxu1 %vm194_vm4, %v653_v8  ;;  %s295_s16 = sshll.u32 %s654_s5, 4  ;;  %s296_s16 = int_to_ptr.vmem [resolvable:$true] %s295_s16 }
 0x2e8   :  { %v282_v9 = vrot.slane %v337_v0, 4  ;;  %s571_s17 = scalar_lea.vmem %s296_s16, 128  ;;  %p576_p11 = scmp.lt.s32.totalorder %s296_s16, %s296_s16 }
 0x2e9   :  { %p572_p10 = scmp.ne.s32.totalorder %s296_s16, %s571_s17  ;;  %p577_p12 = scmp.lt.s32.totalorder %s571_s17, %s571_s17 }
 0x2ea   :  { %v283_v10 = vadd.f32 %v337_v0, %v282_v9 }
 0x2eb   :  { %p578_p13 = por %p577_p12, %p576_p11 }
 0x2ec   :  { %v284_v11 = vrot.slane %v283_v10, 2 }
 0x2ed   :  { %p579_p0 = pnand %p578_p13, %p572_p10 }
 0x2ee   :  { %v285_v12 = vadd.f32 %v284_v11, %v283_v10 }
 0x2f0   :  { %v286_v13 = vrot.slane %v285_v12, 1 }
 0x2f2   :  { %v287_v14 = vadd.f32 %v286_v13, %v285_v12 }
 0x2f4   :  { %288 = vst [vmem:[#allocation11] sm:$0x1] %v287_v14 }
 0x3ba   :  { %v263_v15 = vpop.f32.mrb[0].mxu1 }
 0x3bb   :  { %v268_v16 = vsub.f32 %v263_v15, %v750_v26  ;;  %267 = vst [vmem:[#allocation8] sm:$0xff] %v263_v15  ;;  %v442_v17 = vpop.f32.mrb[1].mxu1 }
 0x3bd   :  { %v269_v18 = vmul.f32 %v268_v16, %v268_v16 }
 0x3bf   :  { %270 = vadd.xlane.f32.xlu1 %v269_v18 }
 0x3c0   :  { %582 = shalt.err (!%p579_p0)
}
 0x3c1   :  { %s583_s20 = scalar_lea.hbm %s820_s4, 128 }
 0x3c2   :  { %p584_p1 = scmp.ne.s32.totalorder %s820_s4, %s583_s20  ;;  %p587_p2 = scmp.lt.u32.totalorder %s583_s20, %s820_s4 }
 0x3c4   :  { %p589_p3 = pnand %p587_p2, %p584_p1 }
 0x3c6   :  { %592 = shalt.err (!%p589_p3)
}
 0x3c7   :  { %298 = dma.vmem_to_hbm [thread:$0]  %s296_s16, 128, %s820_s4, [#allocation4]   ;;  %vm280_vm5 = vcmask 0  }
 0x3c8   :  { %s655_s25 = smov [#allocation9]   ;;  %s656_s28 = smov [#allocation11]  }
 0x3c9   :  { %s307_s27 = sshll.u32 %s655_s25, 4  ;;  %s317_s29 = sshll.u32 %s656_s28, 4  ;;  %s308_s27 = int_to_ptr.vmem [resolvable:$true] %s307_s27  ;;  %s784_s29 = int_to_ptr.vmem [resolvable:$true] %s317_s29 }
 0x3ca   :  { %s593_s4 = scalar_lea.vmem %s308_s27, 16  ;;  %s597_s8 = scalar_lea.vmem %s308_s27, 32 }
 0x3cb   :  { %p594_p4 = scmp.ne.s32.totalorder %s308_s27, %s593_s4  ;;  %p598_p5 = scmp.lt.s32.totalorder %s308_s27, %s308_s27 }
 0x3cc   :  { %p599_p6 = scmp.lt.s32.totalorder %s597_s8, %s593_s4 }
 0x3ce   :  { %p600_p7 = por %p599_p6, %p598_p5 }
 0x3d0   :  { %p601_p8 = pnand %p600_p7, %p594_p4 }
 0x44c   :  { %v271_v1 = vpop.xlane.xlu1 %270 }
 0x44d   :  { %v272_v19 = vrot.slane %v271_v1, 4 }
 0x44f   :  { %v273_v20 = vadd.f32 %v272_v19, %v271_v1 }
 0x451   :  { %v274_v21 = vrot.slane %v273_v20, 2 }
 0x453   :  { %v275_v22 = vadd.f32 %v274_v21, %v273_v20 }
 0x455   :  { %v276_v23 = vrot.slane %v275_v22, 1 }
 0x457   :  { %v277_v24 = vadd.f32 %v276_v23, %v275_v22 }
 0x459   :  { %491 = vpush %v277_v24 }
 0x48a   :  { %s492_s30 = spop %491 }
 0x48b   :  { %v279_v25 = vstv %s492_s30 }
 0x48c   :  { %281 = vst.msk [vmem:[#allocation9] sm:$0x1] %vm280_vm5, %v279_v25 }
 0x48d   :  { %604 = shalt.err (!%p601_p8)
}
 0x48e   :  { %s605_s13 = scalar_lea.hbm %s822_s6, 16 }
 0x48f   :  { %p606_p9 = scmp.ne.s32.totalorder %s822_s6, %s605_s13  ;;  %p609_p10 = scmp.lt.u32.totalorder %s605_s13, %s822_s6 }
 0x491   :  { %p611_p11 = pnand %p609_p10, %p606_p9 }
 0x493   :  { %614 = shalt.err (!%p611_p11)
}
 0x494   :  { %310 = dma.vmem_to_hbm [thread:$0]  %s308_s27, 16, %s822_s6, [#allocation10]  }
 0x495   :  { %s615_s12 = scalar_lea.vmem %s784_s29, 16  ;;  %s619_s5 = scalar_lea.vmem %s784_s29, 32 }
 0x496   :  { %p616_p12 = scmp.ne.s32.totalorder %s784_s29, %s615_s12  ;;  %p620_p13 = scmp.lt.s32.totalorder %s784_s29, %s784_s29 }
 0x497   :  { %p621_p0 = scmp.lt.s32.totalorder %s619_s5, %s615_s12 }
 0x499   :  { %p622_p1 = por %p621_p0, %p620_p13 }
 0x49b   :  { %p623_p2 = pnand %p622_p1, %p616_p12 }
 0x49d   :  { %626 = shalt.err (!%p623_p2)
}
 0x49e   :  { %s627_s18 = scalar_lea.hbm %s823_s7, 16 }
 0x49f   :  { %p628_p3 = scmp.ne.s32.totalorder %s823_s7, %s627_s18  ;;  %p631_p4 = scmp.lt.u32.totalorder %s627_s18, %s823_s7 }
 0x4a1   :  { %p633_p5 = pnand %p631_p4, %p628_p3 }
 0x4a3   :  { %636 = shalt.err (!%p633_p5)
}
 0x4a4   :  { %320 = dma.vmem_to_hbm [thread:$0]  %s784_s29, 16, %s823_s7, [#allocation10]  }
 0x4a5   :  { %641 = dma.done.wait [#allocation4], 128  }
 0x4a6   :  { %642 = vsyncadd [#allocation4], 4294967168 }
 0x4a7   :  { %643 = dma.done.wait [#allocation10], 32  }
 0x4a8   :  { %644 = vsyncadd [#allocation10], 4294967264 }
 0x4a9   :  { %332 = vsyncpa [#allocation3], 1 }
 0x4aa   :  { %333 = vsyncpa [#allocation6], 1 }
 0x4ab   :  { %334 = vsyncpa [#allocation4], 1 }
 0x4ac   :  { %335 = vsyncpa [#allocation10], 1 }

</bundles_post_ra>
